<compile_context>
chip_gen: v7x
topology: tpu7x:2x2x1
jax: 0.10.0
libtpu: 0.0.40
codegen_flags: <defaults>
</compile_context>

<pallas_src>
from functools import partial

import jax
import jax.numpy as jnp
from jax.experimental import pallas as pl
from jax.experimental.pallas import tpu as pltpu


def _grl_identity_kernel(t_ref, o_ref):
    # Forward of GradientReversal is x.clone(): a pure scalar copy, done
    # entirely on the scalar path (SMEM -> sreg -> SMEM).
    o_ref[0] = t_ref[0]


def _identity_copy(global_T):
    """(1,)-shaped identity copy through a minimal SMEM-only Pallas kernel."""
    return pl.pallas_call(
        _grl_identity_kernel,
        out_shape=jax.ShapeDtypeStruct((1,), global_T.dtype),
        in_specs=[pl.BlockSpec(memory_space=pltpu.MemorySpace.SMEM)],
        out_specs=pl.BlockSpec(memory_space=pltpu.MemorySpace.SMEM),
    )(global_T)


# --- GradientReversal: forward = identity (Pallas), backward = lambda_ * g ---
# NOTE: the PyTorch docstring says "-lambda", but the spec code as written
# computes dx = lambda_ * grads; the caller supplies the sign. We match the
# code exactly.
@partial(jax.custom_vjp, nondiff_argnums=(1,))
def gradient_reversal(x, lambda_):
    return _identity_copy(x)


def _grl_fwd(x, lambda_):
    return _identity_copy(x), None


def _grl_bwd(lambda_, _res, g):
    return (lambda_ * g,)


gradient_reversal.defvjp(_grl_fwd, _grl_bwd)


# Jit the actual traced path so the pallas_call launches from inside a single
# compiled executable (amortizes custom-call dispatch). lambda_ is static: it
# is a non-differentiable Python scalar in the spec as well.
@partial(jax.jit, static_argnames=("lambda_",))
def _jitted_grl(global_T, lambda_):
    return gradient_reversal(global_T, lambda_)


def global_t_forward(global_T, fake_input1, fake_input2, lambda_):
    """JAX/Pallas equivalent of Global_T.forward.

    Args:
      global_T: (1,) float32 parameter.
      fake_input1, fake_input2: ignored (as in the PyTorch module); never
        threaded into the compiled program, so they cost nothing.
      lambda_: static Python scalar; only affects the backward pass.

    Returns:
      (1,) float32 copy of global_T.
    """
    del fake_input1, fake_input2  # unused in the forward pass
    return _jitted_grl(global_T, float(lambda_))


if __name__ == "__main__":
    key = jax.random.PRNGKey(0)
    k1, k2 = jax.random.split(key)

    # Parameter: nn.Parameter(torch.ones(1)) -> deterministic ones.
    global_T = jnp.ones((1,), dtype=jnp.float32)

    # Fake inputs (unused by the forward; never enter the compiled program).
    fake_input1 = jax.random.normal(k1, (2, 4, 16, 16), dtype=jnp.float32)
    fake_input2 = jax.random.normal(k2, (2, 4, 16, 16), dtype=jnp.float32)
    lambda_ = 1.0

    out = global_t_forward(global_T, fake_input1, fake_input2, lambda_)
    out = jax.block_until_ready(out)

    assert out.shape == (1,), out.shape
    assert out.dtype == jnp.float32, out.dtype
    assert jnp.allclose(out, global_T), (out, global_T)

    # Backward semantics check: d/d(global_T) sum(grl(global_T, lambda_))
    # must equal lambda_ (matches the spec code's dx = lambda_ * grads).
    grad_fn = jax.jit(
        jax.grad(lambda t: jnp.sum(gradient_reversal(t, lambda_)))
    )
    g = jax.block_until_ready(grad_fn(global_T))
    assert jnp.allclose(g, jnp.full((1,), lambda_, dtype=jnp.float32)), g

    print("KERNEL_OK")
</pallas_src>

<mosaic_0001>
module attributes {stable_mosaic.version = 11 : i64} {
  func.func @_grl_identity_kernel(%arg0: memref<1xf32, #tpu.memory_space<smem>>, %arg1: memref<1xf32, #tpu.memory_space<smem>>) attributes {dimension_semantics = [], scalar_prefetch = 0 : i64, scratch_operands = 0 : i64, tpu.core_type = #tpu.core_type<tc>} {
    %c0 = arith.constant 0 : index
    %0 = memref.load %arg0[%c0] : memref<1xf32, #tpu.memory_space<smem>>
    %c0_0 = arith.constant 0 : index
    %1 = memref.load %arg1[%c0_0] : memref<1xf32, #tpu.memory_space<smem>>
    memref.store %0, %arg1[%c0_0] : memref<1xf32, #tpu.memory_space<smem>>
    return
  }
}

</mosaic_0001>

<bundles_post_ra>
// kernel: _jitted_grl.1
= control target key start
LH: loop header
LB: loop body
LE: loop exit
PB: predicated region body
PF: predicated region fallthrough
CT: control target
= control target key end

     0   :  { %7 = vsyncpa [#allocation4], 0  ;;  %s65_s0 = inlined_call_operand.<no memory space> [shape: f32[1], index: 0, kind: input, shape index: {}]   ;;  %s66_s1 = inlined_call_operand.hbm [shape: f32[1], index: 1, kind: output, shape index: {}]  }
   0x1   :  { %12 = sst [smem:[#allocation3]] %s65_s0  ;;  %s27_s10 = scalar_lea.hbm %s66_s1, 16 }
   0x2   :  { %p28_p0 = scmp.ne.s32.totalorder %s66_s1, %s27_s10  ;;  %p31_p1 = scmp.lt.u32.totalorder %s27_s10, %s66_s1 }
   0x4   :  { %p33_p2 = pnand %p31_p1, %p28_p0 }
   0x6   :  { %36 = shalt.err (!%p33_p2)
}
   0x7   :  { %s39_s15 = smov [#allocation3]  }
   0x8   :  { %20 = dma.smem_to_hbm %s39_s15, 16, %s66_s1, [#allocation4]  }
   0x9   :  { %37 = dma.done.wait [#allocation4], 16  }
   0xa   :  { %38 = vsyncadd [#allocation4], 4294967280 }
   0xb   :  { %24 = sfence }
   0xc   :  { %25 = vsyncpa [#allocation4], 1 }

</bundles_post_ra>
